<compile_context>
chip_gen: v7x
topology: tpu7x:2x2x1
jax: 0.10.0
libtpu: 0.0.40
codegen_flags: <defaults>
</compile_context>

<pallas_src>
import jax
import jax.numpy as jnp
from jax.experimental import pallas as pl
from jax.experimental.pallas import tpu as pltpu


# ---------------------------------------------------------------------------
# Kernel 1: fused  (tok_emb + pos_emb) -> dropout(id) -> trf_blocks(id) -> final_norm(id)
# ---------------------------------------------------------------------------
def _embed_fuse_kernel(tok_ref, pos_ref, o_ref):
    # x = tok_embeds + pos_embeds   (pos broadcast over batch, in registers)
    x = tok_ref[...] + pos_ref[...][None, :, :]
    # drop_emb: eval-mode dropout == identity.
    # TODO(synk): training-mode dropout would use pltpu.prng_seed + prng_random_bits.
    # trf_blocks (DummyTransformerBlock xN): identity forward -> fused away.
    # final_norm (DummyLayerNorm): identity forward -> fused away.
    o_ref[...] = x


def _fused_embed(tok_embeds, pos_embeds):
    """tok_embeds: (B, S, H), pos_embeds: (S, H) -> (B, S, H).

    Whole-array VMEM blocks, no grid: removes per-step pipeline overhead and
    double-buffer allocation. (Tile rows in multiples of 8 if B*S grows large.)
    """
    B, S, H = tok_embeds.shape
    return pl.pallas_call(
        _embed_fuse_kernel,
        out_shape=jax.ShapeDtypeStruct((B, S, H), tok_embeds.dtype),
        in_specs=[
            pl.BlockSpec(memory_space=pltpu.MemorySpace.VMEM),
            pl.BlockSpec(memory_space=pltpu.MemorySpace.VMEM),
        ],
        out_specs=pl.BlockSpec(memory_space=pltpu.MemorySpace.VMEM),
    )(tok_embeds, pos_embeds)


# ---------------------------------------------------------------------------
# Kernel 2: out_head  —  tiled MXU matmul  (M, K) @ (K, N) -> (M, N)
# ---------------------------------------------------------------------------
def _matmul_kernel(x_ref, w_ref, o_ref, acc_ref):
    @pl.when(pl.program_id(2) == 0)
    def _init():
        acc_ref[...] = jnp.zeros_like(acc_ref)

    acc_ref[...] += jnp.dot(
        x_ref[...], w_ref[...], preferred_element_type=jnp.float32
    )

    @pl.when(pl.program_id(2) == pl.num_programs(2) - 1)
    def _store():
        o_ref[...] = acc_ref[...].astype(o_ref.dtype)


def _round_up(x, m):
    return ((x + m - 1) // m) * m


def _out_head_matmul(x, w):
    M, K = x.shape
    K2, N = w.shape
    assert K == K2
    # Lane dims must be multiples of 128; prefer 256-aligned tiles (v6e/v7x MXU).
    assert K % 128 == 0 and N % 128 == 0
    tk = 256 if K % 256 == 0 else 128
    tn = 256 if N % 256 == 0 else 128
    # Sublane-align the row dim (multiples of 8 for f32); cap the row tile.
    tm = min(256, _round_up(M, 8))
    M_pad = _round_up(M, tm)
    if M_pad != M:
        x = jnp.pad(x, ((0, M_pad - M), (0, 0)))

    out = pl.pallas_call(
        _matmul_kernel,
        out_shape=jax.ShapeDtypeStruct((M_pad, N), x.dtype),
        grid_spec=pltpu.PrefetchScalarGridSpec(
            num_scalar_prefetch=0,
            grid=(M_pad // tm, N // tn, K // tk),   # K (reduction) is the last axis
            in_specs=[
                pl.BlockSpec((tm, tk), lambda i, j, k: (i, k)),
                pl.BlockSpec((tk, tn), lambda i, j, k: (k, j)),
            ],
            out_specs=pl.BlockSpec((tm, tn), lambda i, j, k: (i, j)),
            scratch_shapes=[pltpu.VMEM((tm, tn), jnp.float32)],
        ),
        compiler_params=pltpu.CompilerParams(
            dimension_semantics=("parallel", "parallel", "arbitrary"),
        ),
    )(x, w)
    return out[:M]


# ---------------------------------------------------------------------------
# Full DummyGPTModel forward
# ---------------------------------------------------------------------------
def dummy_gpt_forward(in_idx, tok_emb_table, pos_emb_table, w_out):
    """in_idx: (B, S) int32 token ids
       tok_emb_table: (vocab, H); pos_emb_table: (context_len, H)
       w_out: (H, vocab)   (== nn.Linear(H, vocab, bias=False).weight.T)
    """
    B, S = in_idx.shape
    H = tok_emb_table.shape[1]
    V = w_out.shape[1]

    # Token-embedding gather (data-dependent vocab-row lookup): left to XLA's
    # native gather; everything downstream is Pallas.
    # TODO(synk): for production vocab sizes do this gather inside a Pallas kernel
    # (memory_space=pl.ANY + pltpu.make_async_copy) fused with the add below.
    tok_embeds = jnp.take(tok_emb_table, in_idx, axis=0)          # (B, S, H)
    pos_embeds = pos_emb_table[:S]                                # (S, H)

    x = _fused_embed(tok_embeds, pos_embeds)                      # (B, S, H)

    # Collapse (B, S) -> rows so the MXU kernel sees a lane/sublane-dense 2-D problem.
    logits2d = _out_head_matmul(x.reshape(B * S, H), w_out)       # (B*S, V)
    return logits2d.reshape(B, S, V)


if __name__ == "__main__":
    # Small config consistent with the module (emb_dim matches x = torch.rand(2, 4, 768)).
    cfg = dict(vocab_size=2048, context_length=16, emb_dim=768,
               n_layers=2, drop_rate=0.1)
    B, S = 2, 4

    key = jax.random.PRNGKey(0)
    k_idx, k_tok, k_pos, k_out = jax.random.split(key, 4)
    in_idx = jax.random.randint(k_idx, (B, S), 0, cfg["vocab_size"], dtype=jnp.int32)
    tok_emb = 0.02 * jax.random.normal(
        k_tok, (cfg["vocab_size"], cfg["emb_dim"]), jnp.float32)
    pos_emb = 0.02 * jax.random.normal(
        k_pos, (cfg["context_length"], cfg["emb_dim"]), jnp.float32)
    w_out = 0.02 * jax.random.normal(
        k_out, (cfg["emb_dim"], cfg["vocab_size"]), jnp.float32)

    logits = dummy_gpt_forward(in_idx, tok_emb, pos_emb, w_out)
    logits = jax.block_until_ready(logits)

    # Plain-JAX reference of the same forward pass.
    x_ref = jnp.take(tok_emb, in_idx, axis=0) + pos_emb[:S][None]
    ref = jnp.dot(
        x_ref.reshape(B * S, cfg["emb_dim"]), w_out,
        preferred_element_type=jnp.float32,
    ).reshape(B, S, cfg["vocab_size"])

    assert logits.shape == (B, S, cfg["vocab_size"])
    assert logits.dtype == jnp.float32
    assert jnp.allclose(logits, ref, rtol=2e-2, atol=1e-4), \
        float(jnp.max(jnp.abs(logits - ref)))
    print("KERNEL_OK")
</pallas_src>

<mosaic_0001>
module attributes {stable_mosaic.version = 11 : i64} {
  func.func @_embed_fuse_kernel(%arg0: memref<2x4x768xf32, #tpu.memory_space<vmem>>, %arg1: memref<4x768xf32, #tpu.memory_space<vmem>>, %arg2: memref<2x4x768xf32, #tpu.memory_space<vmem>>) attributes {dimension_semantics = [], scalar_prefetch = 0 : i64, scratch_operands = 0 : i64, tpu.core_type = #tpu.core_type<tc>} {
    %c0 = arith.constant 0 : index
    %c0_0 = arith.constant 0 : index
    %c0_1 = arith.constant 0 : index
    %0 = vector.load %arg0[%c0, %c0_0, %c0_1] : memref<2x4x768xf32, #tpu.memory_space<vmem>>, vector<2x4x768xf32>
    %c0_2 = arith.constant 0 : index
    %c0_3 = arith.constant 0 : index
    %1 = vector.load %arg1[%c0_2, %c0_3] : memref<4x768xf32, #tpu.memory_space<vmem>>, vector<4x768xf32>
    %2 = vector.shape_cast %1 : vector<4x768xf32> to vector<1x4x768xf32>
    %3 = vector.broadcast %2 : vector<1x4x768xf32> to vector<2x4x768xf32>
    %4 = arith.addf %0, %3 : vector<2x4x768xf32>
    %c0_4 = arith.constant 0 : index
    %c0_5 = arith.constant 0 : index
    %c0_6 = arith.constant 0 : index
    %5 = vector.load %arg2[%c0_4, %c0_5, %c0_6] : memref<2x4x768xf32, #tpu.memory_space<vmem>>, vector<2x4x768xf32>
    tpu.vector_store %arg2[%c0_4, %c0_5, %c0_6], %4 {strides = array<i32>} : memref<2x4x768xf32, #tpu.memory_space<vmem>>, vector<2x4x768xf32>,
    return
  }
}

</mosaic_0001>

<bundles_post_ra>
// kernel: tpu_custom_call.1
= control target key start
LH: loop header
LB: loop body
LE: loop exit
PB: predicated region body
PF: predicated region fallthrough
CT: control target
= control target key end

     0   :  { %7 = vsyncpa [#allocation3], 0  ;;  %s216_s0 = inlined_call_operand.hbm [shape: f32[2,4,768], index: 0, kind: input, shape index: {}]   ;;  %s217_s1 = inlined_call_operand.hbm [shape: f32[4,768], index: 1, kind: input, shape index: {}]   ;;  %s218_s2 = inlined_call_operand.hbm [shape: f32[2,4,768], index: 2, kind: output, shape index: {}]  }
   0x1   :  { %8 = vsyncpa [#allocation6], 0 }
   0x2   :  { %9 = vsyncpa [#allocation4], 0  ;;  %s154_s9 = smov [#allocation2]   ;;  %s82_s13 = scalar_lea.hbm %s216_s0, 768 }
   0x3   :  { %s15_s10 = sshll.u32 %s154_s9, 4  ;;  %p83_p0 = scmp.ne.s32.totalorder %s216_s0, %s82_s13  ;;  %s16_s10 = int_to_ptr.vmem [resolvable:$true] %s15_s10 }
   0x4   :  { %p86_p1 = scmp.lt.u32.totalorder %s82_s13, %s216_s0 }
   0x6   :  { %p88_p2 = pnand %p86_p1, %p83_p0 }
   0x8   :  { %91 = shalt.err (!%p88_p2)
}
   0x9   :  { %s92_s18 = scalar_lea.vmem %s16_s10, 768  ;;  %p97_p4 = scmp.lt.s32.totalorder %s16_s10, %s16_s10 }
   0xa   :  { %p93_p3 = scmp.ne.s32.totalorder %s16_s10, %s92_s18  ;;  %p98_p5 = scmp.lt.s32.totalorder %s92_s18, %s92_s18 }
   0xc   :  { %p99_p6 = por %p98_p5, %p97_p4 }
   0xe   :  { %p100_p7 = pnand %p99_p6, %p93_p3 }
  0x10   :  { %103 = shalt.err (!%p100_p7)
}
  0x11   :  { %s155_s19 = smov 384   ;;  %s156_s20 = smov 24  }
  0x12   :  { %21 = dma.hbm_to_vmem [thread:$0]  %s216_s0, 768, %s16_s10, [#allocation3], %s155_s19, %s155_s19, %s156_s20  }
  0x13   :  { %s157_s23 = smov [#allocation5]   ;;  %s104_s27 = scalar_lea.hbm %s217_s1, 384 }
  0x14   :  { %s28_s24 = sshll.u32 %s157_s23, 4  ;;  %p105_p8 = scmp.ne.s32.totalorder %s217_s1, %s104_s27  ;;  %s29_s24 = int_to_ptr.vmem [resolvable:$true] %s28_s24 }
  0x15   :  { %p108_p9 = scmp.lt.u32.totalorder %s104_s27, %s217_s1 }
  0x17   :  { %p110_p10 = pnand %p108_p9, %p105_p8 }
  0x19   :  { %113 = shalt.err (!%p110_p10)
}
  0x1a   :  { %s114_s4 = scalar_lea.vmem %s29_s24, 384  ;;  %p119_p12 = scmp.lt.s32.totalorder %s29_s24, %s29_s24 }
  0x1b   :  { %p115_p11 = scmp.ne.s32.totalorder %s29_s24, %s114_s4  ;;  %p120_p13 = scmp.lt.s32.totalorder %s114_s4, %s114_s4 }
  0x1d   :  { %p121_p0 = por %p120_p13, %p119_p12 }
  0x1f   :  { %p122_p1 = pnand %p121_p0, %p115_p11 }
  0x21   :  { %125 = shalt.err (!%p122_p1)
}
  0x22   :  { %31 = dma.hbm_to_vmem [thread:$0]  %s217_s1, 384, %s29_s24, [#allocation6]  }
  0x23   :  { %148 = dma.done.wait [#allocation3], 768  }
  0x24   :  { %149 = vsyncadd [#allocation3], 4294966528 }
  0x25   :  { %150 = dma.done.wait [#allocation6], 384  }
  0x26   :  { %151 = vsyncadd [#allocation6], 4294966912  ;;  %v38_v0 = vld [vmem:[#allocation2] sm:$0xff]  ;;  %v44_v1 = vld [vmem:[#allocation5] sm:$0xff]  ;;  %s158_s6 = smov [#allocation7]  }
  0x27   :  { %v39_v2 = vld [vmem:[#allocation2 + $0x8] sm:$0xff]  ;;  %s64_s7 = sshll.u32 %s158_s6, 4  ;;  %v47_v3 = vadd.f32 %v44_v1, %v38_v0  ;;  %v45_v4 = vld [vmem:[#allocation5 + $0x8] sm:$0xff]  ;;  %v40_v5 = vld [vmem:[#allocation2 + $0x10] sm:$0xff]  ;;  %s65_s7 = int_to_ptr.vmem [resolvable:$true] %s64_s7 }
  0x28   :  { %v46_v6 = vld [vmem:[#allocation5 + $0x10] sm:$0xff]  ;;  %v48_v7 = vadd.f32 %v45_v4, %v39_v2  ;;  %v41_v9 = vld [vmem:[#allocation2 + $0x18] sm:$0xff]  ;;  %v43_v11 = vld [vmem:[#allocation2 + $0x28] sm:$0xff]  ;;  %s126_s1 = scalar_lea.vmem %s65_s7, 768  ;;  %p131_p3 = scmp.lt.s32.totalorder %s65_s7, %s65_s7 }
  0x29   :  { %v49_v8 = vadd.f32 %v46_v6, %v40_v5  ;;  %v42_v10 = vld [vmem:[#allocation2 + $0x20] sm:$0xff]  ;;  %53 = vst [vmem:[#allocation7] sm:$0xff] %v47_v3  ;;  %v50_v12 = vadd.f32 %v44_v1, %v41_v9  ;;  %v52_v14 = vadd.f32 %v46_v6, %v43_v11  ;;  %p127_p2 = scmp.ne.s32.totalorder %s65_s7, %s126_s1  ;;  %p132_p4 = scmp.lt.s32.totalorder %s126_s1, %s126_s1 }
  0x2a   :  { %v51_v13 = vadd.f32 %v45_v4, %v42_v10  ;;  %54 = vst [vmem:[#allocation7 + $0x8] sm:$0xff] %v48_v7 }
  0x2b   :  { %55 = vst [vmem:[#allocation7 + $0x10] sm:$0xff] %v49_v8  ;;  %56 = vst [vmem:[#allocation7 + $0x18] sm:$0xff] %v50_v12  ;;  %p133_p5 = por %p132_p4, %p131_p3 }
  0x2c   :  { %57 = vst [vmem:[#allocation7 + $0x20] sm:$0xff] %v51_v13  ;;  %58 = vst [vmem:[#allocation7 + $0x28] sm:$0xff] %v52_v14 }
  0x2d   :  { %p134_p6 = pnand %p133_p5, %p127_p2 }
  0x2f   :  { %137 = shalt.err (!%p134_p6)
}
  0x30   :  { %s138_s10 = scalar_lea.hbm %s218_s2, 768 }
  0x31   :  { %p139_p7 = scmp.ne.s32.totalorder %s218_s2, %s138_s10  ;;  %p142_p8 = scmp.lt.u32.totalorder %s138_s10, %s218_s2 }
  0x33   :  { %p144_p9 = pnand %p142_p8, %p139_p7 }
  0x35   :  { %147 = shalt.err (!%p144_p9)
}
  0x36   :  { %70 = dma.vmem_to_hbm [thread:$0]  %s65_s7, 768, %s218_s2, [#allocation4], %s155_s19, %s155_s19, %s156_s20  }
  0x37   :  { %152 = dma.done.wait [#allocation4], 768  }
  0x38   :  { %153 = vsyncadd [#allocation4], 4294966528 }
  0x39   :  { %74 = vsyncpa [#allocation3], 1 }
  0x3a   :  { %75 = vsyncpa [#allocation6], 1 }
  0x3b   :  { %76 = vsyncpa [#allocation4], 1 }

</bundles_post_ra>
